<compile_context>
chip_gen: v6e
topology: v6e:2x2x1
jax: 0.10.0
libtpu: 0.0.40
codegen_flags: <defaults>
</compile_context>

<pallas_src>
import jax
import jax.numpy as jnp
from jax.experimental import pallas as pl
from jax.experimental.pallas import tpu as pltpu


def _round_up(v, m):
    return (v + m - 1) // m * m


def _pad2d(a, rows, cols):
    pr, pc = rows - a.shape[0], cols - a.shape[1]
    if pr or pc:
        a = jnp.pad(a, ((0, pr), (0, pc)))
    return a


def _linear_zeros_kernel(x_ref, wt_ref, p_ref, o_ref):
    # MXU matmul: (tile_m, C_in_p) @ (C_in_p, C_out_p), f32 accumulation.
    acc = jnp.dot(x_ref[...], wt_ref[...], preferred_element_type=jnp.float32)
    # p_ref rows: [0] = bias, [1] = exp(logs * logscale_factor).  Broadcast
    # over rows; same op order as PyTorch: (x @ W.T + b) * exp(...).
    acc = (acc + p_ref[0:1, :]) * p_ref[1:2, :]
    o_ref[...] = acc.astype(o_ref.dtype)


def linear_zeros(x, weight, bias, logs, *, logscale_factor=3):
    """x: (..., C_in); weight: (C_out, C_in); bias, logs: (C_out,)."""
    orig_shape = x.shape
    c_in = orig_shape[-1]
    c_out = weight.shape[0]

    x2 = x.reshape(-1, c_in)
    n = x2.shape[0]
    dt = x2.dtype
    itemsize = jnp.dtype(dt).itemsize

    # ---- lane-dense padding targets (multiples of 128 on channel dims) -----
    c_in_p = _round_up(c_in, 128)
    c_out_p = _round_up(c_out, 128)

    # ---- batch tile selection ------------------------------------------------
    # Big tiles (<= 512 rows, multiple of 8); keep >= 2 grid steps when there
    # is enough work so the "parallel" axis can be split across TensorCores.
    if n >= 16:
        tile_m = min(512, _round_up(n, 16) // 2)
    else:
        tile_m = _round_up(max(n, 8), 8)
    n_pad = _round_up(n, tile_m)
    grid_m = n_pad // tile_m

    # ---- wrapper-side glue: conditional pads, pre-transpose, hoist the exp ---
    x_p = _pad2d(x2, n_pad, c_in_p)
    wt_p = _pad2d(weight.T.astype(dt), c_in_p, c_out_p)

    scale = jnp.exp(logs.astype(jnp.float32) * float(logscale_factor))
    params = jnp.zeros((8, c_out_p), jnp.float32)          # one (8,128k) tile
    params = params.at[0, :c_out].set(bias.astype(jnp.float32))
    params = params.at[1, :c_out].set(scale)

    # ---- VMEM budget: 2x-buffered x/out tiles + resident W + param block -----
    block_bytes = (
        2 * tile_m * c_in_p * itemsize        # double-buffered x tiles
        + 2 * tile_m * c_out_p * itemsize     # double-buffered out tiles
        + c_in_p * c_out_p * itemsize         # resident weight block
        + 2 * 8 * c_out_p * 4                 # bias/scale block (f32)
    )
    vmem_limit = min(max(int(block_bytes * 3 // 2) + (1 << 20), 16 << 20),
                     48 << 20)

    cost = pl.CostEstimate(
        flops=2 * n_pad * c_in_p * c_out_p,
        transcendentals=0,
        bytes_accessed=(n_pad * c_in_p + c_in_p * c_out_p
                        + n_pad * c_out_p) * itemsize,
    )

    out_p = pl.pallas_call(
        _linear_zeros_kernel,
        out_shape=jax.ShapeDtypeStruct((n_pad, c_out_p), dt),
        grid_spec=pl.GridSpec(
            grid=(grid_m,),
            in_specs=[
                pl.BlockSpec((tile_m, c_in_p), lambda i: (i, 0)),
                pl.BlockSpec((c_in_p, c_out_p), lambda i: (0, 0)),
                pl.BlockSpec((8, c_out_p), lambda i: (0, 0)),
            ],
            out_specs=pl.BlockSpec((tile_m, c_out_p), lambda i: (i, 0)),
        ),
        compiler_params=pltpu.CompilerParams(
            dimension_semantics=("parallel",),
            vmem_limit_bytes=vmem_limit,
        ),
        cost_estimate=cost,
    )(x_p, wt_p, params)

    out = out_p[:n, :c_out]
    return out.reshape(*orig_shape[:-1], c_out)


if __name__ == "__main__":
    key = jax.random.PRNGKey(0)
    kx, kw, kb, kl, kx3 = jax.random.split(key, 5)

    # Deliberately non-aligned small shapes to exercise the padding paths.
    n, c_in, c_out = 20, 48, 96
    logscale_factor = 3

    x = jax.random.normal(kx, (n, c_in), dtype=jnp.float32)

    # Module __init__ zero-inits weight/bias/logs; use small deterministic
    # nonzero values so the compute path is actually exercised.
    weight = 0.05 * jax.random.normal(kw, (c_out, c_in), dtype=jnp.float32)
    bias = 0.05 * jax.random.normal(kb, (c_out,), dtype=jnp.float32)
    logs = 0.05 * jax.random.normal(kl, (c_out,), dtype=jnp.float32)

    out = linear_zeros(x, weight, bias, logs, logscale_factor=logscale_factor)
    out = jax.block_until_ready(out)

    ref = (x @ weight.T + bias) * jnp.exp(logs * logscale_factor)
    assert out.shape == (n, c_out)
    assert jnp.allclose(out, ref, atol=1e-4, rtol=1e-4), "mismatch vs reference"

    # Leading batch dims (linear over the last axis), small n -> single tile.
    x3 = jax.random.normal(kx3, (2, 5, c_in), dtype=jnp.float32)
    out3 = jax.block_until_ready(
        linear_zeros(x3, weight, bias, logs, logscale_factor=logscale_factor))
    ref3 = (x3 @ weight.T + bias) * jnp.exp(logs * logscale_factor)
    assert out3.shape == (2, 5, c_out)
    assert jnp.allclose(out3, ref3, atol=1e-4, rtol=1e-4), "3D mismatch"

    # Aligned-shape path (no padding copies): n, c_in, c_out already aligned.
    xa = jax.random.normal(kx, (256, 128), dtype=jnp.float32)
    wa = 0.05 * jax.random.normal(kw, (128, 128), dtype=jnp.float32)
    ba = 0.05 * jax.random.normal(kb, (128,), dtype=jnp.float32)
    la = 0.05 * jax.random.normal(kl, (128,), dtype=jnp.float32)
    outa = jax.block_until_ready(
        linear_zeros(xa, wa, ba, la, logscale_factor=logscale_factor))
    refa = (xa @ wa.T + ba) * jnp.exp(la * logscale_factor)
    assert jnp.allclose(outa, refa, atol=1e-4, rtol=1e-4), "aligned mismatch"

    # Literal zero-init case from __init__ (output must be exactly 0).
    zero_out = linear_zeros(x, jnp.zeros((c_out, c_in), jnp.float32),
                            jnp.zeros((c_out,), jnp.float32),
                            jnp.zeros((c_out,), jnp.float32),
                            logscale_factor=logscale_factor)
    zero_out = jax.block_until_ready(zero_out)
    assert jnp.allclose(zero_out, 0.0)

    print("KERNEL_OK")
</pallas_src>

<mosaic_0001>
module attributes {stable_mosaic.version = 11 : i64} {
  func.func @_linear_zeros_kernel(%arg0: i32, %arg1: memref<16x128xf32, #tpu.memory_space<vmem>>, %arg2: memref<128x128xf32, #tpu.memory_space<vmem>>, %arg3: memref<8x128xf32, #tpu.memory_space<vmem>>, %arg4: memref<16x128xf32, #tpu.memory_space<vmem>>) attributes {dimension_semantics = [#tpu.dimension_semantics<parallel>], iteration_bounds = array<i64: 2>, scalar_prefetch = 0 : i64, scratch_operands = 0 : i64, tpu.core_type = #tpu.core_type<tc>, window_params = [{transform_indices = @transform_0, window_bounds = array<i64: 16, 128>}, {pipeline_mode = #tpu.pipeline_mode<synchronous>, transform_indices = @transform_1, window_bounds = array<i64: 128, 128>}, {pipeline_mode = #tpu.pipeline_mode<synchronous>, transform_indices = @transform_2, window_bounds = array<i64: 8, 128>}, {transform_indices = @transform_3, window_bounds = array<i64: 16, 128>}]} {
    %c0 = arith.constant 0 : index
    %c0_0 = arith.constant 0 : index
    %0 = vector.load %arg1[%c0, %c0_0] : memref<16x128xf32, #tpu.memory_space<vmem>>, vector<16x128xf32>
    %c0_1 = arith.constant 0 : index
    %c0_2 = arith.constant 0 : index
    %1 = vector.load %arg2[%c0_1, %c0_2] : memref<128x128xf32, #tpu.memory_space<vmem>>, vector<128x128xf32>
    %cst = arith.constant dense<0.000000e+00> : vector<16x128xf32>
    %2 = tpu.matmul %0, %1, %cst {dimension_numbers = #tpu.dot_dimension_numbers<[1], [0], [0], [1], [0, 0, 1, 1], [], []>} : vector<16x128xf32>, vector<128x128xf32>, vector<16x128xf32> -> vector<16x128xf32>
    %c0_3 = arith.constant 0 : index
    %c0_4 = arith.constant 0 : index
    %3 = vector.load %arg3[%c0_3, %c0_4] : memref<8x128xf32, #tpu.memory_space<vmem>>, vector<1x128xf32>
    %4 = vector.broadcast %3 : vector<1x128xf32> to vector<16x128xf32>
    %5 = arith.addf %2, %4 : vector<16x128xf32>
    %c1 = arith.constant 1 : index
    %c0_5 = arith.constant 0 : index
    %6 = vector.load %arg3[%c1, %c0_5] : memref<8x128xf32, #tpu.memory_space<vmem>>, vector<1x128xf32>
    %7 = vector.broadcast %6 : vector<1x128xf32> to vector<16x128xf32>
    %8 = arith.mulf %5, %7 : vector<16x128xf32>
    %c0_6 = arith.constant 0 : index
    %c0_7 = arith.constant 0 : index
    %9 = vector.load %arg4[%c0_6, %c0_7] : memref<16x128xf32, #tpu.memory_space<vmem>>, vector<16x128xf32>
    tpu.vector_store %arg4[%c0_6, %c0_7], %8 {strides = array<i32>} : memref<16x128xf32, #tpu.memory_space<vmem>>, vector<16x128xf32>,
    return
  }
  func.func @transform_0(%arg0: i32) -> (i32, i32) {
    %c0_i32 = arith.constant 0 : i32
    %c0_i32_0 = arith.constant 0 : i32
    return %arg0, %c0_i32 : i32, i32
  }
  func.func @transform_1(%arg0: i32) -> (i32, i32) {
    %c0_i32 = arith.constant 0 : i32
    %c0_i32_0 = arith.constant 0 : i32
    %c0_i32_1 = arith.constant 0 : i32
    return %c0_i32, %c0_i32_0 : i32, i32
  }
  func.func @transform_2(%arg0: i32) -> (i32, i32) {
    %c0_i32 = arith.constant 0 : i32
    %c0_i32_0 = arith.constant 0 : i32
    %c0_i32_1 = arith.constant 0 : i32
    return %c0_i32, %c0_i32_0 : i32, i32
  }
  func.func @transform_3(%arg0: i32) -> (i32, i32) {
    %c0_i32 = arith.constant 0 : i32
    %c0_i32_0 = arith.constant 0 : i32
    return %arg0, %c0_i32 : i32, i32
  }
}

</mosaic_0001>

<bundles_post_ra>
// kernel: tpu_custom_call.1
= control target key start
LH: loop header
LB: loop body
LE: loop exit
PB: predicated region body
PF: predicated region fallthrough
CT: control target
= control target key end

     0   :  { %8 = vsyncpa [#allocation3], 0  ;;  %s957_s0 = inlined_call_operand.hbm [shape: f32[32,128], index: 0, kind: input, shape index: {}]   ;;  %s958_s1 = inlined_call_operand.hbm [shape: f32[128,128], index: 1, kind: input, shape index: {}]   ;;  %s959_s2 = inlined_call_operand.hbm [shape: f32[8,128], index: 2, kind: input, shape index: {}]   ;;  %s960_s3 = inlined_call_operand.hbm [shape: f32[32,128], index: 3, kind: output, shape index: {}]  }
   0x1   :  { %10 = vsyncpa [#allocation3 + $0x1], 0 }
   0x2   :  { %11 = vsyncpa [#allocation6], 0 }
   0x3   :  { %12 = vsyncpa [#allocation4], 0 }
   0x4   :  { %14 = vsyncpa [#allocation4 + $0x1], 0  ;;  %s755_s12 = smov 0   ;;  %s757_s13 = smov 0  }
   0x5   :  { %s759_s14 = smov 0   ;;  %s761_s15 = smov 0  }
   0x6 LB: > { %s776_s16 = sadd.s32 4294967295, %s725_s15   ;;  %s431_s17 = sadd.s32 4294967294, %s725_s15   ;;  %s725_s15 = sphi %s761_s15, %s981_s15   ;;  %s721_s14 = sphi %s759_s14, %s980_s14   ;;  %s717_s13 = sphi %s757_s13, %s979_s13   ;;  %s713_s12 = sphi %s755_s12, %s978_s12  }
   0x7   : > { %p40_p0 = scmp.ne.s32.totalorder %s717_s13, %s713_s12  ;;  %p961_p1 = scmp.eq.s32.totalorder %s776_s16, 0 }
   0x8   : > { %p106_p2 = scmp.eq.s32.totalorder %s776_s16, 1  ;;  %p112_p3 = scmp.eq.s32.totalorder %s431_s17, 1 }
   0x9   : > { %p785_p4 = por %p961_p1, %p40_p0  ;;  %p432_p5 = scmp.ge.s32.totalorder %s725_s15, 1 }
   0xa   : > { %p790_p6 = por %p112_p3, %p40_p0  ;;  %p119_p7 = scmp.lt.s32.totalorder %s725_s15, 3 }
   0xb   : > { %s965_s18 = scalar_select %p785_p4, 1, 0 }
   0xc   : > { %s966_s19 = scalar_select %p790_p6, 1, 0 }
   0xd   : > { %p795_p8 = pnand %p432_p5, %p119_p7  ;;  %s727_s21 = smov [#allocation5]  }
   0xe   : > { %s131_s22 = sshll.u32 %s727_s21, 4  ;;  %s728_s24 = smov [#allocation7]   ;;  %s132_s22 = int_to_ptr.vmem [resolvable:$true] %s131_s22 }
   0xf   : > { %s967_s20 = scalar_select %p795_p8, 1, 0 }
  0x10   : > { %p518_p9 = pneg %p795_p8  ;;  %s145_s25 = sshll.u32 %s728_s24, 4  ;;  %s146_s25 = int_to_ptr.vmem [resolvable:$true] %s145_s25 }
  0x11   : > { %s588_s26 = scalar_lea.vmem %s132_s22, 2048  ;;  %p596_p5 = scmp.lt.s32.totalorder %s132_s22, %s132_s22 }
  0x12   : > { %p804_p11 = pnand %p518_p9, %p961_p1  ;;  %p589_p13 = scmp.ne.s32.totalorder %s132_s22, %s588_s26 }
  0x13   : > { %p597_p7 = scmp.lt.s32.totalorder %s588_s26, %s588_s26 }
  0x14   : > { %p579_p12 = pneg %p804_p11 }
  0x15   : > { %p598_p10 = por %p597_p7, %p596_p5 }
  0x16   : > { %p591_p0 = pnand %p589_p13, %p579_p12 }
  0x18   : > { %p592_p3 = pneg %p591_p0 }
  0x1a   : > { %p599_p9 = pnand %p598_p10, %p592_p3 }
  0x1c   : > { %602 = shalt.err (!%p599_p9)
}
  0x1d   : > { %s729_s27 = smov 128   ;;  %s730_s28 = smov 8  }
  0x1e   : > { %521 = dma.hbm_to_vmem [thread:$0]  (!%p804_p11), %s958_s1, 2048, %s132_s22, [#allocation6], %s729_s27, %s729_s27, %s730_s28  }
  0x1f   : > { %s614_s4 = scalar_lea.vmem %s146_s25, 128  ;;  %p622_p10 = scmp.lt.s32.totalorder %s146_s25, %s146_s25 }
  0x20   : > { %p615_p13 = scmp.ne.s32.totalorder %s146_s25, %s614_s4  ;;  %p623_p3 = scmp.lt.s32.totalorder %s614_s4, %s614_s4 }
  0x22   : > { %p617_p0 = pnand %p615_p13, %p579_p12  ;;  %p624_p7 = por %p623_p3, %p622_p10 }
  0x24   : > { %p618_p5 = pneg %p617_p0 }
  0x26   : > { %p625_p9 = pnand %p624_p7, %p618_p5 }
  0x28   : > { %628 = shalt.err (!%p625_p9)
}
  0x29   : > { %524 = dma.hbm_to_vmem [thread:$0]  (!%p804_p11), %s959_s2, 128, %s146_s25, [#allocation6]  }
  0x2a   : > { %s830_s7 = sadd.s32 1, %s725_s15   ;;  %s27_s8 = sadd.s32 1, %s721_s14 }
  0x2b   : > { %s24_s9 = ssub.s32 %s725_s15, %s830_s7  ;;  %p34_p12 = scmp.ne.s32.totalorder %s721_s14, %s717_s13 }
  0x2c   : > { %p25_p13 = scmp.eq.s32.totalorder %s24_s9, 0  ;;  %p35_p0 = scmp.eq.s32.totalorder %s725_s15, 0 }
  0x2d   : > { %p840_p5 = por %p106_p2, %p34_p12  ;;  %p535_p10 = scmp.lt.s32.totalorder %s725_s15, 2 }
  0x2e   : > { %s846_s11 = scalar_select %p25_p13, %s721_s14, %s27_s8  }
  0x2f   : > { %s969_s10 = scalar_select %p840_p5, 1, 0 }
  0x30   : > { %p36_p3 = por %p35_p0, %p34_p12  ;;  %s156_s17 = sand.u32 1, %s721_s14  }
  0x31   : > { %s436_s21 = sshll.u32 %s156_s17, 4  ;;  %s451_s22 = sshll.u32 %s725_s15, 8 }
  0x32   : > { %s853_s25 = scalar_lea.hbm %s957_s0, %s451_s22  ;;  %s160_s26 = scalar_lea.vmem [#allocation2], %s436_s21 }
  0x33   : > { %s167_s29 = sshll.u32 %s160_s26, 4  ;;  %p857_p2 = pnand %p535_p10, %p36_p3  ;;  %s855_s29 = int_to_ptr.vmem [resolvable:$true] %s167_s29 }
  0x34   : > { %s861_s4 = scalar_lea.sflag [#allocation3], %s156_s17  ;;  %s629_s5 = scalar_lea.hbm %s853_s25, 256 }
  0x35   : > { %p630_p11 = scmp.ne.s32.totalorder %s853_s25, %s629_s5  ;;  %p631_p7 = pneg %p857_p2 }
  0x36   : > { %s634_s9 = scalar_lea.hbm %s957_s0, 512  ;;  %p635_p13 = scmp.lt.s32.totalorder %s853_s25, %s957_s0 }
  0x37   : > { %p632_p9 = pnand %p631_p7, %p630_p11  ;;  %p636_p0 = scmp.lt.s32.totalorder %s634_s9, %s629_s5 }
  0x39   : > { %p633_p12 = pneg %p632_p9  ;;  %p637_p10 = por %p636_p0, %p635_p13 }
  0x3b   : > { %p638_p3 = pnand %p637_p10, %p633_p12 }
  0x3d   : > { %641 = shalt.err (!%p638_p3)
}
  0x3e   : > { %s642_s17 = scalar_lea.vmem %s855_s29, 256  ;;  %s731_s23 = smov [#allocation2]  }
  0x3f   : > { %p643_p1 = scmp.ne.s32.totalorder %s855_s29, %s642_s17  ;;  %s647_s24 = sshll.u32 %s731_s23, 4  ;;  %s648_s24 = int_to_ptr.vmem [resolvable:$false] %s647_s24 }
  0x40   : > { %s649_s26 = scalar_lea.vmem %s648_s24, 512  ;;  %p650_p9 = scmp.lt.s32.totalorder %s855_s29, %s648_s24 }
  0x41   : > { %p645_p6 = pnand %p643_p1, %p631_p7  ;;  %p651_p5 = scmp.lt.s32.totalorder %s649_s26, %s642_s17 }
  0x43   : > { %p646_p11 = pneg %p645_p6  ;;  %p652_p4 = por %p651_p5, %p650_p9 }
  0x45   : > { %p653_p8 = pnand %p652_p4, %p646_p11 }
  0x47   : > { %656 = shalt.err (!%p653_p8)
}
  0x48   : > { %528 = dma.hbm_to_vmem [thread:$0]  (!%p857_p2), %s853_s25, 256, %s855_s29, %s861_s4, %s729_s27, %s729_s27, %s730_s28  }
  0x49   : > { %p971_p1 = scmp.ne.s32.totalorder %s967_s20, 0 }
  0x4a   : > { %s888_s5 = sand.u32 (!%p971_p1), 1, %s717_s13   ;;  %p972_p4 = scmp.ne.s32.totalorder (!%p971_p1), %s965_s18, 0 }
  0x4b   : > { %179 = sbr.rel (%p971_p1) target bundleno = 330 (0x14a), region = 32  ;;  %s440_s6 = sshll.u32 (!%p971_p1), %s888_s5, 4 }
  0x4c   : > { %s182_s8 = scalar_lea.sflag (!%p971_p1), [#allocation3], %s888_s5  ;;  %s894_s30 = scalar_lea.vmem (!%p971_p1), [#allocation2], %s440_s6 }
  0x50   : > { %700 = dma.done.wait (%p972_p4), %s182_s8, 256  }
  0x51   : > { %702 = vsyncadd (%p972_p4), %s182_s8, 4294967040  ;;  %p973_p6 = scmp.eq.s32.totalorder %s776_s16, 0 }
  0x53   : > { %704 = dma.done.wait (%p973_p6), [#allocation6], 2176   ;;  %p974_p8 = pmov %p973_p6 }
  0x54   : > { %v235_v0 = vld [vmem:[#allocation5 + $0x78] sm:$0xff]  ;;  %v234_v1 = vld [vmem:[#allocation5 + $0x70] sm:$0xff]  ;;  %v233_v2 = vld [vmem:[#allocation5 + $0x68] sm:$0xff]  ;;  %s215_s18 = scalar_lea.vmem [#allocation8], %s440_s6  ;;  %s452_s27 = sshll.u32 %s776_s16, 8 }
  0x55   : > { %706 = vsyncadd (%p974_p8), [#allocation6], 4294965120  ;;  %471 = vmatprep.subr.mxu0 %v235_v0  ;;  %v232_v3 = vld [vmem:[#allocation5 + $0x60] sm:$0xff]  ;;  %v231_v5 = vld [vmem:[#allocation5 + $0x58] sm:$0xff]  ;;  %s339_s20 = sshll.u32 %s215_s18, 4  ;;  %s914_s29 = scalar_lea.hbm %s960_s3, %s452_s27  ;;  %s909_s20 = int_to_ptr.vmem [resolvable:$true] %s339_s20 }
  0x56   : > { %472 = vmatpush3.msra.mxu0 %v235_v0  ;;  %v218_v4 = vld [vmem:[%s894_s30] sm:$0xff]  ;;  %v229_v7 = vld [vmem:[#allocation5 + $0x48] sm:$0xff]  ;;  %v227_v9 = vld [vmem:[#allocation5 + $0x38] sm:$0xff]  ;;  %s326_s4 = scalar_lea.sflag [#allocation4], %s888_s5  ;;  %s657_s9 = scalar_lea.vmem %s909_s20, 256 }
  0x57   : > { %473 = vmatprep.subr.mxu0 %v234_v1  ;;  %503 = vmatprep.mubr.f32.mxu0 %v218_v4  ;;  %v230_v6 = vld [vmem:[#allocation5 + $0x50] sm:$0xff]  ;;  %v228_v8 = vld [vmem:[#allocation5 + $0x40] sm:$0xff]  ;;  %v225_v11 = vld [vmem:[#allocation5 + $0x28] sm:$0xff]  ;;  %p658_p5 = scmp.ne.s32.totalorder %s909_s20, %s657_s9  ;;  %p975_p2 = scmp.ne.s32.totalorder %s969_s10, 0 }
  0x58   : > { %474 = vmatpush3.msra.mxu0 %v234_v1  ;;  %v226_v10 = vld [vmem:[#allocation5 + $0x30] sm:$0xff]  ;;  %v224_v12 = vld [vmem:[#allocation5 + $0x20] sm:$0xff]  ;;  %v223_v13 = vld [vmem:[#allocation5 + $0x18] sm:$0xff]  ;;  %s732_s16 = smov [#allocation8]  }
  0x59   : > { %475 = vmatprep.subr.mxu0 %v233_v2  ;;  %v222_v14 = vld [vmem:[#allocation5 + $0x10] sm:$0xff]  ;;  %v221_v15 = vld [vmem:[#allocation5 + $0x8] sm:$0xff]  ;;  %v220_v16 = vld [vmem:[#allocation5] sm:$0xff]  ;;  %p659_p7 = pnand %p658_p5, %p975_p2  ;;  %s661_s21 = sshll.u32 %s732_s16, 4  ;;  %s662_s21 = int_to_ptr.vmem [resolvable:$false] %s661_s21 }
  0x5a   : > { %476 = vmatpush3.msra.mxu0 %v233_v2  ;;  %v219_v17 = vld [vmem:[%s894_s30 + $0x8] sm:$0xff]  ;;  %v444_v18 = vld [vmem:[#allocation7] ss:$0 sm:$0xff]  ;;  %v445_v20 = vld [vmem:[#allocation7 + $0x1] ss:$0 sm:$0xff]  ;;  %s663_s22 = scalar_lea.vmem %s662_s21, 512  ;;  %p664_p13 = scmp.lt.s32.totalorder %s909_s20, %s662_s21 }
  0x5b   : > { %477 = vmatprep.subr.mxu0 %v232_v3  ;;  %p660_p12 = pneg %p659_p7  ;;  %p665_p0 = scmp.lt.s32.totalorder %s663_s22, %s657_s9 }
  0x5c   : > { %478 = vmatpush3.msra.mxu0 %v232_v3 }
  0x5d   : > { %479 = vmatprep.subr.mxu0 %v231_v5  ;;  %p666_p10 = por %p665_p0, %p664_p13 }
  0x5e   : > { %480 = vmatpush3.msra.mxu0 %v231_v5 }
  0x5f   : > { %481 = vmatprep.subr.mxu0 %v230_v6  ;;  %p667_p3 = pnand %p666_p10, %p660_p12 }
  0x60   : > { %482 = vmatpush3.msra.mxu0 %v230_v6 }
  0x61   : > { %483 = vmatprep.subr.mxu0 %v229_v7 }
  0x62   : > { %484 = vmatpush3.msra.mxu0 %v229_v7 }
  0x63   : > { %485 = vmatprep.subr.mxu0 %v228_v8 }
  0x64   : > { %486 = vmatpush3.msra.mxu0 %v228_v8 }
  0x65   : > { %487 = vmatprep.subr.mxu0 %v227_v9 }
  0x66   : > { %488 = vmatpush3.msra.mxu0 %v227_v9 }
  0x67   : > { %489 = vmatprep.subr.mxu0 %v226_v10 }
  0x68   : > { %490 = vmatpush3.msra.mxu0 %v226_v10 }
  0x69   : > { %491 = vmatprep.subr.mxu0 %v225_v11 }
  0x6a   : > { %492 = vmatpush3.msra.mxu0 %v225_v11 }
  0x6b   : > { %493 = vmatprep.subr.mxu0 %v224_v12 }
  0x6c   : > { %494 = vmatpush3.msra.mxu0 %v224_v12 }
  0x6d   : > { %495 = vmatprep.subr.mxu0 %v223_v13 }
  0x6e   : > { %496 = vmatpush3.msra.mxu0 %v223_v13 }
  0x6f   : > { %497 = vmatprep.subr.mxu0 %v222_v14 }
  0x70   : > { %498 = vmatpush3.msra.mxu0 %v222_v14 }
  0x71   : > { %499 = vmatprep.subr.mxu0 %v221_v15 }
  0x72   : > { %500 = vmatpush3.msra.mxu0 %v221_v15 }
  0x73   : > { %501 = vmatprep.subr.mxu0 %v220_v16 }
  0x74   : > { %502 = vmatpush3.msra.mxu0 %v220_v16 }
  0x75   : > { %504 = vmatmul.mubr.f32.vlgmr.msra.gmra.mxu0 %v219_v17 }
 0x135   : > { %v505_v19 = vpop.f32.mrf.mxu0 }
 0x136   : > { %v313_v21 = vadd.f32 %v505_v19, %v444_v18 }
 0x137   : > { %v307_v22 = vpop.f32.mrf.mxu0 }
 0x138   : > { %v322_v23 = vmul.f32 %v445_v20, %v313_v21  ;;  %v308_v24 = vadd.f32 %v444_v18, %v307_v22 }
 0x13a   : > { %324 = vst [vmem:[%s215_s18 + $0x8] sm:$0xff] %v322_v23  ;;  %v321_v25 = vmul.f32 %v445_v20, %v308_v24 }
 0x13c   : > { %323 = vst [vmem:[%s215_s18] sm:$0xff] %v321_v25 }
 0x13d   : > { %670 = shalt.err (!%p667_p3)
}
 0x13e   : > { %s671_s17 = scalar_lea.hbm %s914_s29, 256  ;;  %s675_s26 = scalar_lea.hbm %s960_s3, 512 }
 0x13f   : > { %p672_p11 = scmp.ne.s32.totalorder %s914_s29, %s671_s17  ;;  %p676_p4 = scmp.lt.s32.totalorder %s914_s29, %s960_s3 }
 0x140   : > { %p677_p6 = scmp.lt.s32.totalorder %s675_s26, %s671_s17 }
 0x141   : > { %p673_p9 = pnand %p672_p11, %p975_p2 }
 0x142   : > { %p678_p8 = por %p677_p6, %p676_p4 }
 0x143   : > { %p674_p1 = pneg %p673_p9 }
 0x145   : > { %p679_p5 = pnand %p678_p8, %p674_p1 }
 0x147   : > { %682 = shalt.err (!%p679_p5)
}
 0x148   : > { %s733_s30 = smov 128   ;;  %s734_s18 = smov 8  }
 0x149   : > { %516 = dma.vmem_to_hbm [thread:$0]  (%p975_p2), %s909_s20, 256, %s914_s29, %s326_s4, %s733_s30, %s733_s30, %s734_s18  }
 0x14a PF: > { %s354_s27 = sand.u32 1, %s713_s12   ;;  %p976_p7 = scmp.ne.s32.totalorder %s966_s19, 0 }
 0x14b   : > { %p977_p12 = scmp.ge.s32.totalorder %s725_s15, 2  ;;  %s355_s28 = scalar_lea.sflag [#allocation4], %s354_s27 }
 0x14d   : > { %p530_p13 = pnand %p977_p12, %p976_p7 }
 0x14f   : > { %p531_p0 = pneg %p530_p13 }
 0x151   : > { %708 = dma.done.wait (%p531_p0), %s355_s28, 256  }
 0x152   : > { %710 = vsyncadd (%p531_p0), %s355_s28, 4294967040  ;;  %p17_p10 = scmp.ge.s32.totalorder %s830_s7, 4   ;;  %s978_s12 = smov %s717_s13 }
 0x153   : > { %s979_s13 = smov %s721_s14  ;;  %s980_s14 = smov %s846_s11 }
 0x154   : > { %s981_s15 = smov %s830_s7  ;;  %19 = sbr.rel (!%p17_p10) target bundleno = 6 (0x6), region = 85 }
 0x159   :  { %360 = vsyncpa [#allocation3], 1 }
 0x15a   :  { %362 = vsyncpa [#allocation3 + $0x1], 1 }
 0x15b   :  { %363 = vsyncpa [#allocation6], 1 }
 0x15c   :  { %364 = vsyncpa [#allocation4], 1 }
 0x15d   :  { %366 = vsyncpa [#allocation4 + $0x1], 1 }

</bundles_post_ra>
